<compile_context>
chip_gen: v7x
topology: tpu7x:2x2x1
jax: 0.10.0
libtpu: 0.0.40
codegen_flags: <defaults>
</compile_context>

<pallas_src>
import functools

import jax
import jax.numpy as jnp
import numpy as np
from jax.experimental import pallas as pl
from jax.experimental.pallas import tpu as pltpu

LANE = 128
SUBLANE = 8
_SQRT1_2 = 0.7071067811865476
_NEG_BIG = -1e30


def _round_up(x, m):
    return (x + m - 1) // m * m


def _pick_tile(n_pad, pref):
    t = min(pref, n_pad)
    while n_pad % t != 0:
        t -= LANE
    return max(t, LANE)


def _hw_config():
    """Per-generation knobs: tile size, VMEM limit, score-math dtype.
    v6e/v7x have a bf16 VALU path (2x vreg packing) -> bf16 score math; v5e/older keep f32.
    v7x has only 64 MiB VMEM/TC -> smaller tiles and a 48 MiB scoped limit."""
    kind = ""
    try:
        kind = jax.devices()[0].device_kind.lower()
    except Exception:
        pass
    is_v7 = "7" in kind
    is_v6 = ("v6" in kind) or ("6e" in kind)
    is_v5e = ("v5 lite" in kind) or ("v5e" in kind) or ("v5litepod" in kind)
    score_dtype = jnp.bfloat16 if (is_v6 or is_v7) else jnp.float32
    if is_v7:
        tile_pref, vmem_limit = 256, 48 * 1024 * 1024
    elif is_v6 or is_v5e:
        tile_pref, vmem_limit = 512, 100 * 1024 * 1024
    else:  # v4 / v5p / unknown: conservative defaults
        tile_pref, vmem_limit = 256, 64 * 1024 * 1024
    return tile_pref, vmem_limit, score_dtype


# ----------------------------------------------------------------------------
# Exact GELU via an in-kernel erf approximation (Abramowitz & Stegun 7.1.26).
# ----------------------------------------------------------------------------
def _erf_approx(x):
    a1, a2, a3, a4, a5 = 0.254829592, -0.284496736, 1.421413741, -1.453152027, 1.061405429
    p = 0.3275911
    ax = jnp.abs(x)
    t = 1.0 / (1.0 + p * ax)
    poly = ((((a5 * t + a4) * t + a3) * t + a2) * t + a1) * t
    y = 1.0 - poly * jnp.exp(-ax * ax)
    return jnp.where(x < 0.0, -y, y)


def _gelu_exact(x):
    return x * 0.5 * (1.0 + _erf_approx(x * _SQRT1_2))


def _recip(d):
    """EUP approximate reciprocal + one Newton step (near-exact, off the VALU critical path)."""
    r = pl.reciprocal(d, approx=True)
    return r * (2.0 - d * r)


# ----------------------------------------------------------------------------
# Kernel 1: hoisted projections xl = x@Wl+bl, xr = x@Wr+br, plus xl^T (channel-major)
# ----------------------------------------------------------------------------
def _proj_kernel(x_ref, wl_ref, bl_ref, wr_ref, br_ref, xl_ref, xr_ref, xlt_ref, *, hcr8):
    x = x_ref[...]
    xl = jnp.dot(x, wl_ref[...], preferred_element_type=jnp.float32) + bl_ref[...]
    xl_ref[...] = xl
    xr_ref[...] = jnp.dot(x, wr_ref[...], preferred_element_type=jnp.float32) + br_ref[...]
    # Channel-major copy of xl for lane-dense [1, T_src] broadcasts in the attention kernel.
    # Full-width transpose (aligned to (8,128)) rides the XLU, then slice the real-channel rows.
    xlt_ref[...] = jnp.transpose(xl)[:hcr8, :]


def _project(x_pad, wl, bl, wr, br, *, hcr8, tile, vmem_limit):
    n_pad, in_pad = x_pad.shape
    hc_pack = wl.shape[1]
    kernel = functools.partial(_proj_kernel, hcr8=hcr8)
    return pl.pallas_call(
        kernel,
        out_shape=(jax.ShapeDtypeStruct((n_pad, hc_pack), jnp.float32),
                   jax.ShapeDtypeStruct((n_pad, hc_pack), jnp.float32),
                   jax.ShapeDtypeStruct((hcr8, n_pad), jnp.float32)),
        grid=(n_pad // tile,),
        in_specs=[
            pl.BlockSpec((tile, in_pad), lambda i: (i, 0)),      # x tile
            pl.BlockSpec((in_pad, hc_pack), lambda i: (0, 0)),   # Wl (resident)
            pl.BlockSpec((1, hc_pack), lambda i: (0, 0)),        # bl
            pl.BlockSpec((in_pad, hc_pack), lambda i: (0, 0)),   # Wr (resident)
            pl.BlockSpec((1, hc_pack), lambda i: (0, 0)),        # br
        ],
        out_specs=(pl.BlockSpec((tile, hc_pack), lambda i: (i, 0)),
                   pl.BlockSpec((tile, hc_pack), lambda i: (i, 0)),
                   pl.BlockSpec((hcr8, tile), lambda i: (0, i))),
        compiler_params=pltpu.CompilerParams(
            dimension_semantics=("parallel",),
            vmem_limit_bytes=vmem_limit),
    )(x_pad, wl, bl, wr, br)


# ----------------------------------------------------------------------------
# Kernel 2: GATv2 attention + aggregation, 2-D grid (dst tiles x src blocks), online softmax
# ----------------------------------------------------------------------------
def _gatv2_attn_kernel(maskb_ref, ea_ref, xr_ref, xl_ref, xlt_ref,
                       we_ref, att_ref, bias_ref, out_ref,
                       m_sc, l_sc, acc_sc,
                       *, heads, c_real, hc_pack, negative_slope,
                       apply_gelu, score_dtype):
    j = pl.program_id(1)

    @pl.when(j == 0)
    def _init():
        m_sc[...] = jnp.full_like(m_sc, -jnp.inf)
        l_sc[...] = jnp.zeros_like(l_sc)
        acc_sc[...] = jnp.zeros_like(acc_sc)

    mask_bias = maskb_ref[...].astype(jnp.float32)   # [Td, Ts] additive bias (0 / -1e30)
    ea = ea_ref[...].astype(score_dtype)             # [Td, Ts]
    xr = xr_ref[...].astype(score_dtype)             # [Td, HCp]
    xlt = xlt_ref[...].astype(score_dtype)           # [HCr8, Ts]
    xl = xl_ref[...]                                 # [Ts, HCp] f32 (MXU aggregation operand)

    for h in range(heads):                           # static unroll over heads
        # ---- GATv2 score: lane-dense channel loop; per-channel math in score_dtype,
        #      logits accumulation / softmax in f32 ----
        logits = None
        for c in range(c_real):                      # static unroll, C = 6/8
            col = h * c_real + c
            s = xr[:, col:col + 1] + xlt[col:col + 1, :] + ea * we_ref[h, c].astype(score_dtype)
            s = jnp.maximum(s, negative_slope * s)   # leaky_relu(., 0.2), max form
            contrib = (att_ref[h, c].astype(score_dtype) * s).astype(jnp.float32)
            logits = contrib if logits is None else logits + contrib
        logits = logits + mask_bias                  # masked entries -> ~-1e30

        # ---- online (flash-style) masked softmax update ----
        m_prev = m_sc[:, h:h + 1]                    # [Td, 1]
        m_new = jnp.maximum(m_prev, jnp.max(logits, axis=-1, keepdims=True))
        alpha = jnp.exp(m_prev - m_new)              # [Td, 1]
        p = jnp.exp(logits - m_new)                  # [Td, Ts]
        l_sc[:, h:h + 1] = alpha * l_sc[:, h:h + 1] + jnp.sum(p, axis=-1, keepdims=True)
        m_sc[:, h:h + 1] = m_new

        # ---- aggregation on the MXU into the rescaled running accumulator ----
        if heads == 1:
            agg = jnp.dot(p, xl, preferred_element_type=jnp.float32)       # [Td, HCp]
            acc_sc[...] = alpha * acc_sc[...] + agg
        else:
            sl = slice(h * c_real, (h + 1) * c_real)
            agg = jnp.dot(p, xl[:, sl], preferred_element_type=jnp.float32)
            acc_sc[:, sl] = alpha * acc_sc[:, sl] + agg

    # ---- finalize on the last source block: normalize, add bias, optional GELU ----
    @pl.when(j == pl.num_programs(1) - 1)
    def _fin():
        if heads == 1:
            o = acc_sc[...] * _recip(l_sc[:, 0:1]) + bias_ref[...]
            if apply_gelu:
                o = _gelu_exact(o)
            out_ref[...] = o.astype(out_ref.dtype)
        else:
            hc_real = heads * c_real
            if hc_pack > hc_real:
                out_ref[:, hc_real:] = jnp.zeros(
                    (out_ref.shape[0], hc_pack - hc_real), out_ref.dtype)
            for h in range(heads):
                sl = slice(h * c_real, (h + 1) * c_real)
                o = acc_sc[:, sl] * _recip(l_sc[:, h:h + 1]) + bias_ref[:, sl]
                if apply_gelu:
                    o = _gelu_exact(o)
                out_ref[:, sl] = o.astype(out_ref.dtype)


def _gatv2_attention(mask_bias, ea, xr, xl, xlt, we, att, bias,
                     *, heads, c_real, hc_pack, apply_gelu, tile, vmem_limit, score_dtype):
    n_pad = mask_bias.shape[0]
    hcr8 = xlt.shape[0]
    kernel = functools.partial(
        _gatv2_attn_kernel, heads=heads, c_real=c_real, hc_pack=hc_pack,
        negative_slope=0.2, apply_gelu=apply_gelu, score_dtype=score_dtype)
    smem = pltpu.MemorySpace.SMEM
    return pl.pallas_call(
        kernel,
        out_shape=jax.ShapeDtypeStruct((n_pad, hc_pack), jnp.float32),
        grid=(n_pad // tile, n_pad // tile),
        in_specs=[
            pl.BlockSpec((tile, tile), lambda i, j: (i, j)),         # additive mask bias (bf16)
            pl.BlockSpec((tile, tile), lambda i, j: (i, j)),         # edge-attr block (bf16)
            pl.BlockSpec((tile, hc_pack), lambda i, j: (i, 0)),      # xr dst tile
            pl.BlockSpec((tile, hc_pack), lambda i, j: (j, 0)),      # xl src block (node-major)
            pl.BlockSpec((hcr8, tile), lambda i, j: (0, j)),         # xl^T src block (chan-major)
            pl.BlockSpec(we.shape, lambda i, j: (0, 0), memory_space=smem),   # lin_edge weight
            pl.BlockSpec(att.shape, lambda i, j: (0, 0), memory_space=smem),  # attention vector
            pl.BlockSpec((1, hc_pack), lambda i, j: (0, 0)),         # output bias
        ],
        out_specs=pl.BlockSpec((tile, hc_pack), lambda i, j: (i, 0)),
        scratch_shapes=[
            pltpu.VMEM((tile, heads), jnp.float32),    # m: running row max per head
            pltpu.VMEM((tile, heads), jnp.float32),    # l: running denominator per head
            pltpu.VMEM((tile, hc_pack), jnp.float32),  # acc: running weighted sum (heads packed)
        ],
        compiler_params=pltpu.CompilerParams(
            dimension_semantics=("parallel", "arbitrary"),
            vmem_limit_bytes=vmem_limit),
    )(mask_bias, ea, xr, xl, xlt, we, att, bias)


# ----------------------------------------------------------------------------
# Plain-JAX glue: densify graph, pack/pad params & features to lane-dense layouts
# ----------------------------------------------------------------------------
def edges_to_dense_padded(e_i, e_a, n, n_pad):
    """Additive mask-bias (bf16: 0 where edge, -1e30 where none) and edge-attr matrix (bf16) with
    PyG-style self loops (remove_self_loops + add_self_loops(fill_value='mean')), padded to n_pad.
    Padding rows get a self loop so every softmax row stays benign.
    NOTE: duplicate (multi-)edges overwrite rather than accumulate (differs from PyG if present)."""
    src, dst = e_i[0], e_i[1]
    adj = jnp.zeros((n, n), jnp.float32).at[dst, src].set(1.0)
    ea = jnp.zeros((n, n), jnp.float32).at[dst, src].set(e_a[:, 0].astype(jnp.float32))
    diag = jnp.eye(n, dtype=jnp.float32)
    adj = adj * (1.0 - diag)                                  # remove_self_loops
    ea = ea * (1.0 - diag)
    deg = jnp.sum(adj, axis=1)
    mean_in = jnp.sum(ea, axis=1) / jnp.maximum(deg, 1.0)     # fill_value='mean'
    adj = adj + diag                                          # add_self_loops
    ea = ea + jnp.diag(mean_in)

    adj_p = jnp.zeros((n_pad, n_pad), jnp.float32).at[:n, :n].set(adj)
    adj_p = adj_p + jnp.diag(jnp.concatenate(
        [jnp.zeros((n,), jnp.float32), jnp.ones((n_pad - n,), jnp.float32)]))
    ea_p = jnp.zeros((n_pad, n_pad), jnp.float32).at[:n, :n].set(ea)
    mask_bias = jnp.where(adj_p > 0.0, 0.0, _NEG_BIG).astype(jnp.bfloat16)
    return mask_bias, ea_p.astype(jnp.bfloat16)


def _prepare_layer_params(p, *, heads, c_out, in_real, in_pad):
    """Pack heads*c_out real channels into shared 128-lane blocks (no per-head 128 padding) and
    zero-pad weights/biases so all kernel loads/stores stay lane-dense."""
    hc_real = heads * c_out
    hc_pack = _round_up(hc_real, LANE)
    hcr8 = _round_up(hc_real, SUBLANE)

    def pad_w(w):
        w = jnp.asarray(w, jnp.float32)
        return jnp.zeros((in_pad, hc_pack), jnp.float32).at[:in_real, :hc_real].set(w)

    def pad_b(b):
        b = jnp.asarray(b, jnp.float32).reshape(1, -1)
        return jnp.zeros((1, hc_pack), jnp.float32).at[:, :hc_real].set(b)

    return dict(
        wl=pad_w(p["wl"]), bl=pad_b(p["bl"]),
        wr=pad_w(p["wr"]), br=pad_b(p["br"]),
        we=jnp.asarray(p["we"], jnp.float32).reshape(heads, c_out),
        att=jnp.asarray(p["att"], jnp.float32),
        bias=pad_b(p["bias"]),
        hc_pack=hc_pack, hcr8=hcr8, hc_real=hc_real)


def _gatv2_layer_padded(x_pad, mask_bias, ea, pp, *, heads, c_out, apply_gelu,
                        tile, vmem_limit, score_dtype):
    xl, xr, xlt = _project(x_pad, pp["wl"], pp["bl"], pp["wr"], pp["br"],
                           hcr8=pp["hcr8"], tile=tile, vmem_limit=vmem_limit)
    return _gatv2_attention(mask_bias, ea, xr, xl, xlt, pp["we"], pp["att"], pp["bias"],
                            heads=heads, c_real=c_out, hc_pack=pp["hc_pack"],
                            apply_gelu=apply_gelu, tile=tile, vmem_limit=vmem_limit,
                            score_dtype=score_dtype)


def attention_encoder(x, e_i, e_a, p1, p2, *, heads, mid, out_channels):
    n, fin = x.shape
    n_pad = _round_up(max(n, LANE), LANE)
    tile_pref, vmem_limit, score_dtype = _hw_config()
    tile = _pick_tile(n_pad, tile_pref)
    fin_pad = _round_up(fin, LANE)

    mask_bias, ea = edges_to_dense_padded(e_i, e_a, n, n_pad)
    x_pad = jnp.zeros((n_pad, fin_pad), jnp.float32).at[:n, :fin].set(
        jnp.asarray(x, jnp.float32))

    pp1 = _prepare_layer_params(p1, heads=heads, c_out=mid, in_real=fin, in_pad=fin_pad)
    h1 = _gatv2_layer_padded(x_pad, mask_bias, ea, pp1, heads=heads, c_out=mid,
                             apply_gelu=True, tile=tile, vmem_limit=vmem_limit,
                             score_dtype=score_dtype)

    in2 = int(p2["wl"].shape[0])
    pp2 = _prepare_layer_params(p2, heads=heads, c_out=out_channels,
                                in_real=in2, in_pad=pp1["hc_pack"])
    h2 = _gatv2_layer_padded(h1, mask_bias, ea, pp2, heads=heads, c_out=out_channels,
                             apply_gelu=False, tile=tile, vmem_limit=vmem_limit,
                             score_dtype=score_dtype)
    return h2[:n, :heads * out_channels]


# ----------------------------------------------------------------------------
# Pure-JAX reference (same dense math, same mask bias / bf16 edge attrs / score dtype)
# ----------------------------------------------------------------------------
def _gatv2_layer_ref(x, mask_bias_f32, ea_f32, p, *, heads, c_out, score_dtype):
    hp = jax.lax.Precision.HIGHEST
    xl = jnp.dot(x, jnp.asarray(p["wl"], jnp.float32), precision=hp) + jnp.asarray(p["bl"], jnp.float32)
    xr = jnp.dot(x, jnp.asarray(p["wr"], jnp.float32), precision=hp) + jnp.asarray(p["br"], jnp.float32)
    we = jnp.asarray(p["we"], jnp.float32).reshape(heads, c_out).astype(score_dtype)
    att = jnp.asarray(p["att"], jnp.float32).astype(score_dtype)
    xl_s, xr_s, ea_s = xl.astype(score_dtype), xr.astype(score_dtype), ea_f32.astype(score_dtype)
    outs = []
    for h in range(heads):
        sl = slice(h * c_out, (h + 1) * c_out)
        s = xr_s[:, None, sl] + xl_s[None, :, sl] + ea_s[:, :, None] * we[h][None, None, :]
        s = jnp.maximum(s, 0.2 * s)
        logits = jnp.sum((att[h][None, None, :] * s).astype(jnp.float32), axis=-1)
        logits = logits + mask_bias_f32
        m = jnp.max(logits, axis=-1, keepdims=True)
        pr = jnp.exp(logits - m)
        alpha = pr / jnp.sum(pr, axis=-1, keepdims=True)
        outs.append(jnp.dot(alpha, xl[:, sl], precision=hp))
    out = outs[0] if heads == 1 else jnp.concatenate(outs, axis=-1)
    return out + jnp.asarray(p["bias"], jnp.float32).reshape(1, -1)


def attention_encoder_ref(x, e_i, e_a, p1, p2, *, heads, mid, out_channels):
    n = x.shape[0]
    n_pad = _round_up(max(n, LANE), LANE)
    _, _, score_dtype = _hw_config()
    mask_bias, ea_bf16 = edges_to_dense_padded(e_i, e_a, n, n_pad)
    mb = mask_bias[:n, :n].astype(jnp.float32)
    eaf = ea_bf16[:n, :n].astype(jnp.float32)
    h = _gatv2_layer_ref(jnp.asarray(x, jnp.float32), mb, eaf, p1,
                         heads=heads, c_out=mid, score_dtype=score_dtype)
    h = jax.nn.gelu(h, approximate=False)
    return _gatv2_layer_ref(h, mb, eaf, p2,
                            heads=heads, c_out=out_channels, score_dtype=score_dtype)


# ----------------------------------------------------------------------------
# Deterministic parameter init (GATv2Conv shapes)
# ----------------------------------------------------------------------------
def _glorot(key, shape):
    fan_in, fan_out = shape[0], shape[-1]
    lim = np.sqrt(6.0 / (fan_in + fan_out))
    return jax.random.uniform(key, shape, jnp.float32, -lim, lim)


def init_gatv2_params(key, in_ch, out_ch, heads):
    hc = heads * out_ch
    ks = jax.random.split(key, 7)
    return dict(
        wl=_glorot(ks[0], (in_ch, hc)),                               # lin_l.weight^T
        bl=0.1 * jax.random.normal(ks[1], (1, hc), jnp.float32),      # lin_l.bias
        wr=_glorot(ks[2], (in_ch, hc)),                               # lin_r.weight^T
        br=0.1 * jax.random.normal(ks[3], (1, hc), jnp.float32),      # lin_r.bias
        we=_glorot(ks[4], (1, hc)),                                   # lin_edge.weight^T
        att=_glorot(ks[5], (heads, out_ch)),                          # attention vector
        bias=0.1 * jax.random.normal(ks[6], (1, hc), jnp.float32),    # output bias
    )


# ----------------------------------------------------------------------------
if __name__ == "__main__":
    key = jax.random.PRNGKey(0)
    N, IN_CH, OUT_CH, HEADS = 16, 4, 8, 1
    MID = (IN_CH + OUT_CH) // 2  # 6, as in the PyTorch module

    kx, ke, k1, k2 = jax.random.split(key, 4)
    x = jax.random.normal(kx, (N, IN_CH), jnp.float32)

    # Bidirectional ring graph: no self loops, no duplicate edges.
    idx = jnp.arange(N)
    src = jnp.concatenate([idx, (idx + 1) % N])
    dst = jnp.concatenate([(idx + 1) % N, idx])
    e_i = jnp.stack([src, dst]).astype(jnp.int32)                    # [2, E]  row0=src, row1=dst
    e_a = jax.random.normal(ke, (e_i.shape[1], 1), jnp.float32)      # [E, 1]  edge attrs

    p1 = init_gatv2_params(k1, IN_CH, MID, HEADS)
    p2 = init_gatv2_params(k2, MID, OUT_CH, HEADS)

    out = attention_encoder(x, e_i, e_a, p1, p2,
                            heads=HEADS, mid=MID, out_channels=OUT_CH)
    out = jax.block_until_ready(out)

    ref = attention_encoder_ref(x, e_i, e_a, p1, p2,
                                heads=HEADS, mid=MID, out_channels=OUT_CH)
    np.testing.assert_allclose(np.asarray(out), np.asarray(ref), rtol=2e-2, atol=2e-2)
    assert out.shape == (N, OUT_CH * HEADS)

    print("KERNEL_OK")
</pallas_src>

<mosaic_0001>
module attributes {stable_mosaic.version = 11 : i64} {
  func.func @_proj_kernel(%arg0: i32, %arg1: memref<128x128xf32, #tpu.memory_space<vmem>>, %arg2: memref<128x128xf32, #tpu.memory_space<vmem>>, %arg3: memref<1x128xf32, #tpu.memory_space<vmem>>, %arg4: memref<128x128xf32, #tpu.memory_space<vmem>>, %arg5: memref<1x128xf32, #tpu.memory_space<vmem>>, %arg6: memref<128x128xf32, #tpu.memory_space<vmem>>, %arg7: memref<128x128xf32, #tpu.memory_space<vmem>>, %arg8: memref<8x128xf32, #tpu.memory_space<vmem>>) attributes {dimension_semantics = [#tpu.dimension_semantics<parallel>], iteration_bounds = array<i64: 1>, scalar_prefetch = 0 : i64, scratch_operands = 0 : i64, tpu.core_type = #tpu.core_type<tc>, window_params = [{transform_indices = @transform_0, window_bounds = array<i64: 128, 128>}, {pipeline_mode = #tpu.pipeline_mode<synchronous>, transform_indices = @transform_1, window_bounds = array<i64: 128, 128>}, {pipeline_mode = #tpu.pipeline_mode<synchronous>, transform_indices = @transform_2, window_bounds = array<i64: 1, 128>}, {pipeline_mode = #tpu.pipeline_mode<synchronous>, transform_indices = @transform_3, window_bounds = array<i64: 128, 128>}, {pipeline_mode = #tpu.pipeline_mode<synchronous>, transform_indices = @transform_4, window_bounds = array<i64: 1, 128>}, {transform_indices = @transform_5, window_bounds = array<i64: 128, 128>}, {transform_indices = @transform_6, window_bounds = array<i64: 128, 128>}, {transform_indices = @transform_7, window_bounds = array<i64: 8, 128>}]} {
    %c0 = arith.constant 0 : index
    %c0_0 = arith.constant 0 : index
    %0 = vector.load %arg1[%c0, %c0_0] : memref<128x128xf32, #tpu.memory_space<vmem>>, vector<128x128xf32>
    %c0_1 = arith.constant 0 : index
    %c0_2 = arith.constant 0 : index
    %1 = vector.load %arg2[%c0_1, %c0_2] : memref<128x128xf32, #tpu.memory_space<vmem>>, vector<128x128xf32>
    %cst = arith.constant dense<0.000000e+00> : vector<128x128xf32>
    %2 = tpu.matmul %0, %1, %cst {dimension_numbers = #tpu.dot_dimension_numbers<[1], [0], [0], [1], [0, 0, 1, 1], [], []>} : vector<128x128xf32>, vector<128x128xf32>, vector<128x128xf32> -> vector<128x128xf32>
    %c0_3 = arith.constant 0 : index
    %c0_4 = arith.constant 0 : index
    %3 = vector.load %arg3[%c0_3, %c0_4] : memref<1x128xf32, #tpu.memory_space<vmem>>, vector<1x128xf32>
    %4 = vector.broadcast %3 : vector<1x128xf32> to vector<128x128xf32>
    %5 = arith.addf %2, %4 : vector<128x128xf32>
    %c0_5 = arith.constant 0 : index
    %c0_6 = arith.constant 0 : index
    %6 = vector.load %arg6[%c0_5, %c0_6] : memref<128x128xf32, #tpu.memory_space<vmem>>, vector<128x128xf32>
    tpu.vector_store %arg6[%c0_5, %c0_6], %5 {strides = array<i32>} : memref<128x128xf32, #tpu.memory_space<vmem>>, vector<128x128xf32>,
    %c0_7 = arith.constant 0 : index
    %c0_8 = arith.constant 0 : index
    %7 = vector.load %arg4[%c0_7, %c0_8] : memref<128x128xf32, #tpu.memory_space<vmem>>, vector<128x128xf32>
    %cst_9 = arith.constant dense<0.000000e+00> : vector<128x128xf32>
    %8 = tpu.matmul %0, %7, %cst_9 {dimension_numbers = #tpu.dot_dimension_numbers<[1], [0], [0], [1], [0, 0, 1, 1], [], []>} : vector<128x128xf32>, vector<128x128xf32>, vector<128x128xf32> -> vector<128x128xf32>
    %c0_10 = arith.constant 0 : index
    %c0_11 = arith.constant 0 : index
    %9 = vector.load %arg5[%c0_10, %c0_11] : memref<1x128xf32, #tpu.memory_space<vmem>>, vector<1x128xf32>
    %10 = vector.broadcast %9 : vector<1x128xf32> to vector<128x128xf32>
    %11 = arith.addf %8, %10 : vector<128x128xf32>
    %c0_12 = arith.constant 0 : index
    %c0_13 = arith.constant 0 : index
    %12 = vector.load %arg7[%c0_12, %c0_13] : memref<128x128xf32, #tpu.memory_space<vmem>>, vector<128x128xf32>
    tpu.vector_store %arg7[%c0_12, %c0_13], %11 {strides = array<i32>} : memref<128x128xf32, #tpu.memory_space<vmem>>, vector<128x128xf32>,
    %13 = tpu.transpose %5, [1, 0] : vector<128x128xf32> -> vector<128x128xf32>
    %14 = vector.extract_strided_slice %13 {offsets = [0, 0], sizes = [8, 128], strides = [1, 1]} : vector<128x128xf32> to vector<8x128xf32>
    %c0_14 = arith.constant 0 : index
    %c0_15 = arith.constant 0 : index
    %15 = vector.load %arg8[%c0_14, %c0_15] : memref<8x128xf32, #tpu.memory_space<vmem>>, vector<8x128xf32>
    tpu.vector_store %arg8[%c0_14, %c0_15], %14 {strides = array<i32>} : memref<8x128xf32, #tpu.memory_space<vmem>>, vector<8x128xf32>,
    return
  }
  func.func @transform_0(%arg0: i32) -> (i32, i32) {
    %c0_i32 = arith.constant 0 : i32
    %c0_i32_0 = arith.constant 0 : i32
    return %arg0, %c0_i32 : i32, i32
  }
  func.func @transform_1(%arg0: i32) -> (i32, i32) {
    %c0_i32 = arith.constant 0 : i32
    %c0_i32_0 = arith.constant 0 : i32
    %c0_i32_1 = arith.constant 0 : i32
    return %c0_i32, %c0_i32_0 : i32, i32
  }
  func.func @transform_2(%arg0: i32) -> (i32, i32) {
    %c0_i32 = arith.constant 0 : i32
    %c0_i32_0 = arith.constant 0 : i32
    %c0_i32_1 = arith.constant 0 : i32
    return %c0_i32, %c0_i32_0 : i32, i32
  }
  func.func @transform_3(%arg0: i32) -> (i32, i32) {
    %c0_i32 = arith.constant 0 : i32
    %c0_i32_0 = arith.constant 0 : i32
    %c0_i32_1 = arith.constant 0 : i32
    return %c0_i32, %c0_i32_0 : i32, i32
  }
  func.func @transform_4(%arg0: i32) -> (i32, i32) {
    %c0_i32 = arith.constant 0 : i32
    %c0_i32_0 = arith.constant 0 : i32
    %c0_i32_1 = arith.constant 0 : i32
    return %c0_i32, %c0_i32_0 : i32, i32
  }
  func.func @transform_5(%arg0: i32) -> (i32, i32) {
    %c0_i32 = arith.constant 0 : i32
    %c0_i32_0 = arith.constant 0 : i32
    return %arg0, %c0_i32 : i32, i32
  }
  func.func @transform_6(%arg0: i32) -> (i32, i32) {
    %c0_i32 = arith.constant 0 : i32
    %c0_i32_0 = arith.constant 0 : i32
    return %arg0, %c0_i32 : i32, i32
  }
  func.func @transform_7(%arg0: i32) -> (i32, i32) {
    %c0_i32 = arith.constant 0 : i32
    %c0_i32_0 = arith.constant 0 : i32
    return %c0_i32, %arg0 : i32, i32
  }
}

</mosaic_0001>

<bundles_post_ra>
// kernel: tpu_custom_call.1
= control target key start
LH: loop header
LB: loop body
LE: loop exit
PB: predicated region body
PF: predicated region fallthrough
CT: control target
= control target key end

     0   :  { %13 = vsyncpa [#allocation3], 0  ;;  %s1224_s0 = inlined_call_operand.hbm [shape: f32[128,128], index: 0, kind: input, shape index: {}]   ;;  %s1225_s1 = inlined_call_operand.hbm [shape: f32[128,128], index: 1, kind: input, shape index: {}]   ;;  %s1226_s2 = inlined_call_operand.hbm [shape: f32[1,128], index: 2, kind: input, shape index: {}]   ;;  %s1227_s3 = inlined_call_operand.hbm [shape: f32[128,128], index: 3, kind: input, shape index: {}]   ;;  %s1228_s4 = inlined_call_operand.hbm [shape: f32[1,128], index: 4, kind: input, shape index: {}]   ;;  %s1229_s5 = inlined_call_operand.hbm [shape: f32[128,128], index: 5, kind: output, shape index: {0}]   ;;  %s1230_s6 = inlined_call_operand.hbm [shape: f32[128,128], index: 6, kind: output, shape index: {1}]   ;;  %s1231_s7 = inlined_call_operand.hbm [shape: f32[8,128], index: 7, kind: output, shape index: {2}]  }
   0x1   :  { %14 = vsyncpa [#allocation6], 0 }
   0x2   :  { %15 = vsyncpa [#allocation9], 0 }
   0x3   :  { %16 = vsyncpa [#allocation4], 0 }
   0x4   :  { %17 = vsyncpa [#allocation13], 0  ;;  %s992_s24 = smov [#allocation5]   ;;  %s993_s26 = smov [#allocation8]  }
   0x5   :  { %s35_s25 = sshll.u32 %s992_s24, 4  ;;  %s57_s27 = sshll.u32 %s993_s26, 4  ;;  %s36_s25 = int_to_ptr.vmem [resolvable:$true] %s35_s25  ;;  %s1042_s27 = int_to_ptr.vmem [resolvable:$true] %s57_s27 }
   0x6   :  { %s806_s30 = scalar_lea.hbm %s1225_s1, 2048 }
   0x7   :  { %p807_p0 = scmp.ne.s32.totalorder %s1225_s1, %s806_s30  ;;  %p810_p1 = scmp.lt.u32.totalorder %s806_s30, %s1225_s1 }
   0x9   :  { %p812_p2 = pnand %p810_p1, %p807_p0 }
   0xb   :  { %815 = shalt.err (!%p812_p2)
}
   0xc   :  { %s816_s12 = scalar_lea.vmem %s36_s25, 2048  ;;  %p821_p4 = scmp.lt.s32.totalorder %s36_s25, %s36_s25 }
   0xd   :  { %p817_p3 = scmp.ne.s32.totalorder %s36_s25, %s816_s12  ;;  %p822_p5 = scmp.lt.s32.totalorder %s816_s12, %s816_s12 }
   0xf   :  { %p823_p6 = por %p822_p5, %p821_p4 }
  0x11   :  { %p824_p7 = pnand %p823_p6, %p817_p3 }
  0x13   :  { %827 = shalt.err (!%p824_p7)
}
  0x14   :  { %s994_s13 = smov 128   ;;  %s995_s14 = smov 8  }
  0x15   :  { %41 = dma.hbm_to_vmem [thread:$0]  %s1225_s1, 2048, %s36_s25, [#allocation6], %s994_s13, %s994_s13, %s995_s14  }
  0x16   :  { %s828_s19 = scalar_lea.hbm %s1227_s3, 2048 }
  0x17   :  { %p829_p8 = scmp.ne.s32.totalorder %s1227_s3, %s828_s19  ;;  %p832_p9 = scmp.lt.u32.totalorder %s828_s19, %s1227_s3 }
  0x19   :  { %p834_p10 = pnand %p832_p9, %p829_p8 }
  0x1b   :  { %837 = shalt.err (!%p834_p10)
}
  0x1c   :  { %s838_s24 = scalar_lea.vmem %s1042_s27, 2048  ;;  %p843_p12 = scmp.lt.s32.totalorder %s1042_s27, %s1042_s27 }
  0x1d   :  { %p839_p11 = scmp.ne.s32.totalorder %s1042_s27, %s838_s24  ;;  %p844_p13 = scmp.lt.s32.totalorder %s838_s24, %s838_s24 }
  0x1f   :  { %p845_p0 = por %p844_p13, %p843_p12 }
  0x21   :  { %p846_p1 = pnand %p845_p0, %p839_p11 }
  0x23   :  { %849 = shalt.err (!%p846_p1)
}
  0x24   :  { %63 = dma.hbm_to_vmem [thread:$0]  %s1227_s3, 2048, %s1042_s27, [#allocation9], %s994_s13, %s994_s13, %s995_s14  }
  0x25   :  { %s996_s26 = smov [#allocation2]   ;;  %s997_s29 = smov [#allocation7]  }
  0x26   :  { %s23_s28 = sshll.u32 %s996_s26, 4  ;;  %s48_s30 = sshll.u32 %s997_s29, 4  ;;  %s24_s28 = int_to_ptr.vmem [resolvable:$true] %s23_s28  ;;  %s49_s30 = int_to_ptr.vmem [resolvable:$true] %s48_s30 }
  0x27   :  { %s850_s10 = scalar_lea.hbm %s1224_s0, 2048 }
  0x28   :  { %p851_p2 = scmp.ne.s32.totalorder %s1224_s0, %s850_s10  ;;  %p854_p3 = scmp.lt.u32.totalorder %s850_s10, %s1224_s0 }
  0x2a   :  { %p856_p4 = pnand %p854_p3, %p851_p2 }
  0x2c   :  { %859 = shalt.err (!%p856_p4)
}
  0x2d   :  { %s860_s3 = scalar_lea.vmem %s24_s28, 2048  ;;  %p865_p6 = scmp.lt.s32.totalorder %s24_s28, %s24_s28 }
  0x2e   :  { %p861_p5 = scmp.ne.s32.totalorder %s24_s28, %s860_s3  ;;  %p866_p7 = scmp.lt.s32.totalorder %s860_s3, %s860_s3 }
  0x30   :  { %p867_p8 = por %p866_p7, %p865_p6 }
  0x32   :  { %p868_p9 = pnand %p867_p8, %p861_p5 }
  0x34   :  { %871 = shalt.err (!%p868_p9)
}
  0x35   :  { %29 = dma.hbm_to_vmem [thread:$0]  %s1224_s0, 2048, %s24_s28, [#allocation3], %s994_s13, %s994_s13, %s995_s14  }
  0x36   :  { %s872_s20 = scalar_lea.hbm %s1226_s2, 16 }
  0x37   :  { %p873_p10 = scmp.ne.s32.totalorder %s1226_s2, %s872_s20  ;;  %p876_p11 = scmp.lt.u32.totalorder %s872_s20, %s1226_s2 }
  0x39   :  { %p878_p12 = pnand %p876_p11, %p873_p10 }
  0x3b   :  { %881 = shalt.err (!%p878_p12)
}
  0x3c   :  { %s882_s1 = scalar_lea.vmem %s49_s30, 16  ;;  %s886_s25 = scalar_lea.vmem %s49_s30, 32 }
  0x3d   :  { %p883_p13 = scmp.ne.s32.totalorder %s49_s30, %s882_s1  ;;  %p887_p0 = scmp.lt.s32.totalorder %s49_s30, %s49_s30 }
  0x3e   :  { %p888_p1 = scmp.lt.s32.totalorder %s886_s25, %s882_s1 }
  0x40   :  { %p889_p2 = por %p888_p1, %p887_p0 }
  0x42   :  { %p890_p3 = pnand %p889_p2, %p883_p13 }
  0x44   :  { %893 = shalt.err (!%p890_p3)
}
  0x45   :  { %51 = dma.hbm_to_vmem [thread:$0]  %s1226_s2, 16, %s49_s30, [#allocation6]  }
  0x46   :  { %s998_s28 = smov [#allocation10]   ;;  %s894_s10 = scalar_lea.hbm %s1228_s4, 16 }
  0x47   :  { %s70_s29 = sshll.u32 %s998_s28, 4  ;;  %p895_p4 = scmp.ne.s32.totalorder %s1228_s4, %s894_s10  ;;  %s71_s29 = int_to_ptr.vmem [resolvable:$true] %s70_s29 }
  0x48   :  { %p898_p5 = scmp.lt.u32.totalorder %s894_s10, %s1228_s4 }
  0x4a   :  { %p900_p6 = pnand %p898_p5, %p895_p4 }
  0x4c   :  { %903 = shalt.err (!%p900_p6)
}
  0x4d   :  { %s904_s3 = scalar_lea.vmem %s71_s29, 16  ;;  %s908_s2 = scalar_lea.vmem %s71_s29, 32 }
  0x4e   :  { %p905_p7 = scmp.ne.s32.totalorder %s71_s29, %s904_s3  ;;  %p909_p8 = scmp.lt.s32.totalorder %s71_s29, %s71_s29 }
  0x4f   :  { %p910_p9 = scmp.lt.s32.totalorder %s908_s2, %s904_s3 }
  0x51   :  { %p911_p10 = por %p910_p9, %p909_p8 }
  0x53   :  { %p912_p11 = pnand %p911_p10, %p905_p7 }
  0x55   :  { %915 = shalt.err (!%p912_p11)
}
  0x56   :  { %73 = dma.hbm_to_vmem [thread:$0]  %s1228_s4, 16, %s71_s29, [#allocation9]  }
  0x57   :  { %982 = dma.done.wait [#allocation3], 2048  }
  0x58   :  { %983 = vsyncadd [#allocation3], 4294965248 }
  0x59   :  { %984 = dma.done.wait [#allocation6], 2064  }
  0x5a   :  { %985 = vsyncadd [#allocation6], 4294965232 }
  0x5b   :  { %986 = dma.done.wait [#allocation9], 2064  }
  0x5c   :  { %987 = vsyncadd [#allocation9], 4294965232  ;;  %v105_v0 = vld [vmem:[#allocation5] sm:$0xff]  ;;  %v106_v1 = vld [vmem:[#allocation5 + $0x8] sm:$0xff]  ;;  %s999_s4 = smov [#allocation11]  }
  0x5d   :  { %v107_v2 = vld [vmem:[#allocation5 + $0x10] sm:$0xff]  ;;  %v732_v3 = vpack.c.bf16 %v106_v1, %v105_v0  ;;  %v108_v4 = vld [vmem:[#allocation5 + $0x18] sm:$0xff]  ;;  %v109_v6 = vld [vmem:[#allocation5 + $0x20] sm:$0xff]  ;;  %s511_s17 = sshll.u32 %s999_s4, 4  ;;  %s512_s17 = int_to_ptr.vmem [resolvable:$true] %s511_s17 }
  0x5e   :  { %v736_v5 = vpack.c.bf16 %v108_v4, %v107_v2  ;;  %v110_v7 = vld [vmem:[#allocation5 + $0x28] sm:$0xff]  ;;  %v89_v9 = vld [vmem:[#allocation2] sm:$0xff]  ;;  %v111_v10 = vld [vmem:[#allocation5 + $0x30] sm:$0xff]  ;;  %s916_s18 = scalar_lea.vmem %s512_s17, 2048  ;;  %p921_p13 = scmp.lt.s32.totalorder %s512_s17, %s512_s17 }
  0x5f   :  { %733 = vmatprep.subr.bf16.mxu0 %v732_v3  ;;  %v740_v8 = vpack.c.bf16 %v110_v7, %v109_v6  ;;  %v112_v11 = vld [vmem:[#allocation5 + $0x38] sm:$0xff]  ;;  %652 = vmatprep.mubr.f32.mxu0 %v89_v9  ;;  %v113_v13 = vld [vmem:[#allocation5 + $0x40] sm:$0xff]  ;;  %v114_v14 = vld [vmem:[#allocation5 + $0x48] sm:$0xff]  ;;  %p917_p12 = scmp.ne.s32.totalorder %s512_s17, %s916_s18  ;;  %p922_p0 = scmp.lt.s32.totalorder %s916_s18, %s916_s18 }
  0x60   :  { %735 = vmatpush3.bf16.msra.mxu0 %v732_v3  ;;  %708 = vmatprep.mubr.f32.mxu1 %v89_v9  ;;  %v744_v12 = vpack.c.bf16 %v112_v11, %v111_v10  ;;  %v289_v15 = vld [vmem:[#allocation8] sm:$0xff]  ;;  %v290_v16 = vld [vmem:[#allocation8 + $0x8] sm:$0xff]  ;;  %v291_v17 = vld [vmem:[#allocation8 + $0x10] sm:$0xff]  ;;  %v748_v21 = vpack.c.bf16 %v114_v14, %v113_v13 }
  0x61   :  { %737 = vmatprep.subr.bf16.mxu0 %v736_v5  ;;  %v292_v18 = vld [vmem:[#allocation8 + $0x18] sm:$0xff]  ;;  %v764_v19 = vpack.c.bf16 %v290_v16, %v289_v15  ;;  %v293_v22 = vld [vmem:[#allocation8 + $0x20] sm:$0xff]  ;;  %v294_v23 = vld [vmem:[#allocation8 + $0x28] sm:$0xff]  ;;  %p923_p1 = por %p922_p0, %p921_p13 }
  0x62   :  { %v768_v20 = vpack.c.bf16 %v292_v18, %v291_v17  ;;  %v115_v24 = vld [vmem:[#allocation5 + $0x50] sm:$0xff]  ;;  %v116_v25 = vld [vmem:[#allocation5 + $0x58] sm:$0xff]  ;;  %v772_v26 = vpack.c.bf16 %v294_v23, %v293_v22  ;;  %v117_v30 = vld [vmem:[#allocation5 + $0x60] sm:$0xff] }
  0x63   :  { %765 = vmatprep.subr.bf16.mxu1 %v764_v19  ;;  %v752_v27 = vpack.c.bf16 %v116_v25, %v115_v24  ;;  %v295_v28 = vld [vmem:[#allocation8 + $0x30] sm:$0xff]  ;;  %v296_v29 = vld [vmem:[#allocation8 + $0x38] sm:$0xff]  ;;  %v118_v31 = vld [vmem:[#allocation5 + $0x68] sm:$0xff]  ;;  %p924_p2 = pnand %p923_p1, %p917_p12 }
  0x64   :  { %739 = vmatpush3.bf16.msra.mxu0 %v736_v5  ;;  %767 = vmatpush3.bf16.msra.mxu1 %v764_v19  ;;  %v776_v32 = vpack.c.bf16 %v296_v29, %v295_v28  ;;  %v756_v33 = vpack.c.bf16 %v118_v31, %v117_v30  ;;  %v297_v34 = vld [vmem:[#allocation8 + $0x40] sm:$0xff]  ;;  %v298_v35 = vld [vmem:[#allocation8 + $0x48] sm:$0xff]  ;;  %v120_v37 = vld [vmem:[#allocation5 + $0x78] sm:$0xff] }
  0x65   :  { %741 = vmatprep.subr.bf16.mxu0 %v740_v8  ;;  %769 = vmatprep.subr.bf16.mxu1 %v768_v20  ;;  %v119_v36 = vld [vmem:[#allocation5 + $0x70] sm:$0xff]  ;;  %v780_v38 = vpack.c.bf16 %v298_v35, %v297_v34  ;;  %v300_v41 = vld [vmem:[#allocation8 + $0x58] sm:$0xff]  ;;  %v301_v43 = vld [vmem:[#allocation8 + $0x60] sm:$0xff] }
  0x66   :  { %v760_v39 = vpack.c.bf16 %v120_v37, %v119_v36  ;;  %v299_v40 = vld [vmem:[#allocation8 + $0x50] sm:$0xff]  ;;  %v302_v44 = vld [vmem:[#allocation8 + $0x68] sm:$0xff]  ;;  %v304_v49 = vld [vmem:[#allocation8 + $0x78] sm:$0xff] }
  0x67   :  { %v784_v42 = vpack.c.bf16 %v300_v41, %v299_v40  ;;  %v90_v45 = vld [vmem:[#allocation2 + $0x8] sm:$0xff]  ;;  %v788_v46 = vpack.c.bf16 %v302_v44, %v301_v43  ;;  %v91_v47 = vld [vmem:[#allocation2 + $0x10] sm:$0xff]  ;;  %v92_v50 = vld [vmem:[#allocation2 + $0x18] sm:$0xff] }
  0x68   :  { %743 = vmatpush3.bf16.msra.mxu0 %v740_v8  ;;  %771 = vmatpush3.bf16.msra.mxu1 %v768_v20  ;;  %v303_v48 = vld [vmem:[#allocation8 + $0x70] sm:$0xff]  ;;  %v93_v52 = vld [vmem:[#allocation2 + $0x20] sm:$0xff]  ;;  %v94_v53 = vld [vmem:[#allocation2 + $0x28] sm:$0xff] }
  0x69   :  { %745 = vmatprep.subr.bf16.mxu0 %v744_v12  ;;  %773 = vmatprep.subr.bf16.mxu1 %v772_v26  ;;  %v792_v51 = vpack.c.bf16 %v304_v49, %v303_v48  ;;  %v95_v54 = vld [vmem:[#allocation2 + $0x30] sm:$0xff]  ;;  %v96_v55 = vld [vmem:[#allocation2 + $0x38] sm:$0xff]  ;;  %v97_v56 = vld [vmem:[#allocation2 + $0x40] sm:$0xff] }
  0x6a   :  { %v98_v57 = vld [vmem:[#allocation2 + $0x48] sm:$0xff]  ;;  %v99_v58 = vld [vmem:[#allocation2 + $0x50] sm:$0xff]  ;;  %v100_v59 = vld [vmem:[#allocation2 + $0x58] sm:$0xff] }
  0x6b   :  { %v101_v60 = vld [vmem:[#allocation2 + $0x60] sm:$0xff]  ;;  %v102_v61 = vld [vmem:[#allocation2 + $0x68] sm:$0xff]  ;;  %v103_v62 = vld [vmem:[#allocation2 + $0x70] sm:$0xff] }
  0x6c   :  { %747 = vmatpush3.bf16.msra.mxu0 %v744_v12  ;;  %775 = vmatpush3.bf16.msra.mxu1 %v772_v26  ;;  %v104_v63 = vld [vmem:[#allocation2 + $0x78] sm:$0xff]  ;;  %v1118_v0 = vld [vmem:[#allocation7] ss:$0 sm:$0xff]  ;;  %v1125_v12 = vld [vmem:[#allocation10] ss:$0 sm:$0xff] }
  0x6d   :  { %749 = vmatprep.subr.bf16.mxu0 %v748_v21  ;;  %777 = vmatprep.subr.bf16.mxu1 %v776_v32 }
  0x70   :  { %751 = vmatpush3.bf16.msra.mxu0 %v748_v21  ;;  %779 = vmatpush3.bf16.msra.mxu1 %v776_v32 }
  0x71   :  { %753 = vmatprep.subr.bf16.mxu0 %v752_v27  ;;  %781 = vmatprep.subr.bf16.mxu1 %v780_v38 }
  0x74   :  { %755 = vmatpush3.bf16.msra.mxu0 %v752_v27  ;;  %783 = vmatpush3.bf16.msra.mxu1 %v780_v38 }
  0x75   :  { %757 = vmatprep.subr.bf16.mxu0 %v756_v33  ;;  %785 = vmatprep.subr.bf16.mxu1 %v784_v42 }
  0x78   :  { %759 = vmatpush3.bf16.msra.mxu0 %v756_v33  ;;  %787 = vmatpush3.bf16.msra.mxu1 %v784_v42 }
  0x79   :  { %761 = vmatprep.subr.bf16.mxu0 %v760_v39  ;;  %789 = vmatprep.subr.bf16.mxu1 %v788_v46 }
  0x7c   :  { %763 = vmatpush3.bf16.msra.mxu0 %v760_v39  ;;  %791 = vmatpush3.bf16.msra.mxu1 %v788_v46 }
  0x7d   :  { %793 = vmatprep.subr.bf16.mxu1 %v792_v51 }
  0x7f   :  { %653 = vmatmul.mubr.f32.vlgmr.msra.gmra.mrb[0].mxu0 %v90_v45 }
  0x80   :  { %655 = vmatprep.mubr.f32.mxu0 %v91_v47  ;;  %795 = vmatpush3.bf16.msra.mxu1 %v792_v51 }
  0x83   :  { %656 = vmatmul.mubr.f32.gmra.mrb[2].mxu0 %v92_v50  ;;  %709 = vmatmul.mubr.f32.vlgmr.msra.gmra.mrb[0].mxu1 %v90_v45 }
  0x84   :  { %658 = vmatprep.mubr.f32.mxu0 %v93_v52  ;;  %711 = vmatprep.mubr.f32.mxu1 %v91_v47 }
  0x87   :  { %659 = vmatmul.mubr.f32.gmra.mrb[4].mxu0 %v94_v53  ;;  %712 = vmatmul.mubr.f32.gmra.mrb[2].mxu1 %v92_v50 }
  0x88   :  { %661 = vmatprep.mubr.f32.mxu0 %v95_v54  ;;  %714 = vmatprep.mubr.f32.mxu1 %v93_v52 }
  0x8b   :  { %662 = vmatmul.mubr.f32.gmra.mrb[6].mxu0 %v96_v55  ;;  %715 = vmatmul.mubr.f32.gmra.mrb[4].mxu1 %v94_v53 }
  0x8c   :  { %664 = vmatprep.mubr.f32.mxu0 %v97_v56  ;;  %717 = vmatprep.mubr.f32.mxu1 %v95_v54 }
  0x8f   :  { %665 = vmatmul.mubr.f32.gmra.mrb[8].mxu0 %v98_v57  ;;  %718 = vmatmul.mubr.f32.gmra.mrb[6].mxu1 %v96_v55 }
  0x90   :  { %667 = vmatprep.mubr.f32.mxu0 %v99_v58  ;;  %720 = vmatprep.mubr.f32.mxu1 %v97_v56 }
  0x93   :  { %668 = vmatmul.mubr.f32.gmra.mrb[10].mxu0 %v100_v59  ;;  %721 = vmatmul.mubr.f32.gmra.mrb[8].mxu1 %v98_v57 }
  0x94   :  { %670 = vmatprep.mubr.f32.mxu0 %v101_v60  ;;  %723 = vmatprep.mubr.f32.mxu1 %v99_v58 }
  0x97   :  { %671 = vmatmul.mubr.f32.gmra.mrb[12].mxu0 %v102_v61  ;;  %724 = vmatmul.mubr.f32.gmra.mrb[10].mxu1 %v100_v59 }
  0x98   :  { %673 = vmatprep.mubr.f32.mxu0 %v103_v62  ;;  %726 = vmatprep.mubr.f32.mxu1 %v101_v60 }
  0x9b   :  { %674 = vmatmul.mubr.f32.gmra.mrb[14].mxu0 %v104_v63  ;;  %727 = vmatmul.mubr.f32.gmra.mrb[12].mxu1 %v102_v61 }
  0x9c   :  { %729 = vmatprep.mubr.f32.mxu1 %v103_v62 }
  0x9f   :  { %730 = vmatmul.mubr.f32.gmra.mrb[14].mxu1 %v104_v63 }
 0x152   :  { %v654_v1 = vpop.f32.mrb[0].mxu0 }
 0x153   :  { %v200_v2 = vadd.f32 %v654_v1, %v1118_v0  ;;  %v194_v3 = vpop.f32.mrb[1].mxu0 }
 0x154   :  { %v195_v4 = vadd.f32 %v1118_v0, %v194_v3 }
 0x155   :  { %274 = vst [vmem:[#allocation11 + $0x8] sm:$0xff] %v200_v2 }
 0x156   :  { %273 = vst [vmem:[#allocation11] sm:$0xff] %v195_v4  ;;  %473 = vxpose.xlu0.b32.start [1/16] (narrow) %v195_v4, 8  ;;  %v657_v5 = vpop.f32.mrb[2].mxu0  ;;  %v710_v14 = vpop.f32.mrb[0].mxu1 }
 0x157   :  { %v210_v6 = vadd.f32 %v657_v5, %v1118_v0  ;;  %v204_v7 = vpop.f32.mrb[3].mxu0  ;;  %v384_v16 = vadd.f32 %v710_v14, %v1125_v12  ;;  %v378_v17 = vpop.f32.mrb[1].mxu1 }
 0x158   :  { %v205_v8 = vadd.f32 %v1118_v0, %v204_v7  ;;  %v379_v20 = vadd.f32 %v1125_v12, %v378_v17 }
 0x159   :  { %276 = vst [vmem:[#allocation11 + $0x18] sm:$0xff] %v210_v6  ;;  %458 = vst [vmem:[#allocation12 + $0x8] sm:$0xff] %v384_v16 }
 0x15a   :  { %275 = vst [vmem:[#allocation11 + $0x10] sm:$0xff] %v205_v8  ;;  %474 = vxpose.xlu0.b32.cont [2/16] (narrow) %v200_v2, 8  ;;  %v660_v9 = vpop.f32.mrb[4].mxu0  ;;  %457 = vst [vmem:[#allocation12] sm:$0xff] %v379_v20  ;;  %v713_v22 = vpop.f32.mrb[2].mxu1 }
 0x15b   :  { %v220_v10 = vadd.f32 %v660_v9, %v1118_v0  ;;  %v214_v11 = vpop.f32.mrb[5].mxu0  ;;  %v394_v24 = vadd.f32 %v713_v22, %v1125_v12  ;;  %v388_v25 = vpop.f32.mrb[3].mxu1 }
 0x15c   :  { %v215_v13 = vadd.f32 %v1118_v0, %v214_v11  ;;  %v389_v28 = vadd.f32 %v1125_v12, %v388_v25 }
 0x15d   :  { %278 = vst [vmem:[#allocation11 + $0x28] sm:$0xff] %v220_v10  ;;  %460 = vst [vmem:[#allocation12 + $0x18] sm:$0xff] %v394_v24 }
 0x15e   :  { %475 = vxpose.xlu0.b32.cont [3/16] (narrow) %v205_v8, 8  ;;  %277 = vst [vmem:[#allocation11 + $0x20] sm:$0xff] %v215_v13  ;;  %v663_v15 = vpop.f32.mrb[6].mxu0  ;;  %459 = vst [vmem:[#allocation12 + $0x10] sm:$0xff] %v389_v28  ;;  %v716_v30 = vpop.f32.mrb[4].mxu1 }
 0x15f   :  { %v230_v18 = vadd.f32 %v663_v15, %v1118_v0  ;;  %v224_v19 = vpop.f32.mrb[7].mxu0  ;;  %v404_v32 = vadd.f32 %v716_v30, %v1125_v12  ;;  %v398_v33 = vpop.f32.mrb[5].mxu1 }
 0x160   :  { %v225_v21 = vadd.f32 %v1118_v0, %v224_v19  ;;  %v399_v36 = vadd.f32 %v1125_v12, %v398_v33 }
 0x161   :  { %280 = vst [vmem:[#allocation11 + $0x38] sm:$0xff] %v230_v18  ;;  %462 = vst [vmem:[#allocation12 + $0x28] sm:$0xff] %v404_v32 }
 0x162   :  { %476 = vxpose.xlu0.b32.cont [4/16] (narrow) %v210_v6, 8  ;;  %279 = vst [vmem:[#allocation11 + $0x30] sm:$0xff] %v225_v21  ;;  %v666_v23 = vpop.f32.mrb[8].mxu0  ;;  %461 = vst [vmem:[#allocation12 + $0x20] sm:$0xff] %v399_v36  ;;  %v719_v38 = vpop.f32.mrb[6].mxu1 }
 0x163   :  { %v1134_v26 = vadd.f32 %v666_v23, %v1118_v0  ;;  %v234_v27 = vpop.f32.mrb[9].mxu0  ;;  %v414_v40 = vadd.f32 %v719_v38, %v1125_v12  ;;  %v408_v41 = vpop.f32.mrb[7].mxu1 }
 0x164   :  { %v1138_v29 = vadd.f32 %v1118_v0, %v234_v27  ;;  %v409_v44 = vadd.f32 %v1125_v12, %v408_v41 }
 0x165   :  { %282 = vst [vmem:[#allocation11 + $0x48] sm:$0xff] %v1134_v26  ;;  %464 = vst [vmem:[#allocation12 + $0x38] sm:$0xff] %v414_v40 }
 0x166   :  { %477 = vxpose.xlu0.b32.cont [5/16] (narrow) %v215_v13, 8  ;;  %281 = vst [vmem:[#allocation11 + $0x40] sm:$0xff] %v1138_v29  ;;  %v669_v31 = vpop.f32.mrb[10].mxu0  ;;  %463 = vst [vmem:[#allocation12 + $0x30] sm:$0xff] %v409_v44  ;;  %v722_v46 = vpop.f32.mrb[8].mxu1 }
 0x167   :  { %v1144_v34 = vadd.f32 %v669_v31, %v1118_v0  ;;  %v244_v35 = vpop.f32.mrb[11].mxu0  ;;  %v424_v48 = vadd.f32 %v722_v46, %v1125_v12  ;;  %v418_v49 = vpop.f32.mrb[9].mxu1 }
 0x168   :  { %v1148_v37 = vadd.f32 %v1118_v0, %v244_v35  ;;  %v419_v52 = vadd.f32 %v1125_v12, %v418_v49 }
 0x169   :  { %284 = vst [vmem:[#allocation11 + $0x58] sm:$0xff] %v1144_v34  ;;  %466 = vst [vmem:[#allocation12 + $0x48] sm:$0xff] %v424_v48 }
 0x16a   :  { %478 = vxpose.xlu0.b32.cont [6/16] (narrow) %v220_v10, 8  ;;  %283 = vst [vmem:[#allocation11 + $0x50] sm:$0xff] %v1148_v37  ;;  %v672_v39 = vpop.f32.mrb[12].mxu0  ;;  %465 = vst [vmem:[#allocation12 + $0x40] sm:$0xff] %v419_v52  ;;  %v725_v54 = vpop.f32.mrb[10].mxu1 }
 0x16b   :  { %v1154_v42 = vadd.f32 %v672_v39, %v1118_v0  ;;  %v254_v43 = vpop.f32.mrb[13].mxu0  ;;  %v434_v55 = vadd.f32 %v725_v54, %v1125_v12  ;;  %v428_v56 = vpop.f32.mrb[11].mxu1 }
 0x16c   :  { %v1158_v45 = vadd.f32 %v1118_v0, %v254_v43  ;;  %v429_v57 = vadd.f32 %v1125_v12, %v428_v56 }
 0x16d   :  { %286 = vst [vmem:[#allocation11 + $0x68] sm:$0xff] %v1154_v42 }
 0x16e   :  { %479 = vxpose.xlu0.b32.cont [7/16] (narrow) %v225_v21, 8  ;;  %285 = vst [vmem:[#allocation11 + $0x60] sm:$0xff] %v1158_v45  ;;  %v675_v47 = vpop.f32.mrb[14].mxu0 }
 0x16f   :  { %v1164_v50 = vadd.f32 %v675_v47, %v1118_v0  ;;  %v264_v51 = vpop.f32.mrb[15].mxu0 }
 0x170   :  { %v265_v53 = vadd.f32 %v1118_v0, %v264_v51 }
 0x171   :  { %288 = vst [vmem:[#allocation11 + $0x78] sm:$0xff] %v1164_v50 }
 0x172   :  { %480 = vxpose.xlu0.b32.cont [8/16] (narrow) %v230_v18, 8  ;;  %287 = vst [vmem:[#allocation11 + $0x70] sm:$0xff] %v265_v53 }
 0x173   :  { %927 = shalt.err (!%p924_p2)
}
 0x174   :  { %s928_s21 = scalar_lea.hbm %s1229_s5, 2048 }
 0x175   :  { %p929_p3 = scmp.ne.s32.totalorder %s1229_s5, %s928_s21  ;;  %p932_p4 = scmp.lt.u32.totalorder %s928_s21, %s1229_s5 }
 0x177   :  { %p934_p5 = pnand %p932_p4, %p929_p3 }
 0x179   :  { %937 = shalt.err (!%p934_p5)
}
 0x17a   :  { %517 = dma.vmem_to_hbm [thread:$0]  %s512_s17, 2048, %s1229_s5, [#allocation4], %s994_s13, %s994_s13, %s995_s14   ;;  %468 = vst [vmem:[#allocation12 + $0x58] sm:$0xff] %v434_v55  ;;  %467 = vst [vmem:[#allocation12 + $0x50] sm:$0xff] %v429_v57  ;;  %v728_v58 = vpop.f32.mrb[12].mxu1  ;;  %481 = vxpose.xlu0.b32.cont [9/16] (narrow) %v1138_v29, 8 }
 0x17b   :  { %v444_v59 = vadd.f32 %v728_v58, %v1125_v12  ;;  %v438_v60 = vpop.f32.mrb[13].mxu1  ;;  %s1000_s26 = smov [#allocation12]  }
 0x17c   :  { %v439_v61 = vadd.f32 %v1125_v12, %v438_v60  ;;  %s523_s28 = sshll.u32 %s1000_s26, 4  ;;  %v731_v62 = vpop.f32.mrb[14].mxu1  ;;  %s524_s28 = int_to_ptr.vmem [resolvable:$true] %s523_s28 }
 0x17d   :  { %470 = vst [vmem:[#allocation12 + $0x68] sm:$0xff] %v444_v59  ;;  %v454_v63 = vadd.f32 %v731_v62, %v1125_v12  ;;  %v448_v0 = vpop.f32.mrb[15].mxu1  ;;  %s938_s5 = scalar_lea.vmem %s524_s28, 2048  ;;  %p943_p7 = scmp.lt.s32.totalorder %s524_s28, %s524_s28 }
 0x17e   :  { %469 = vst [vmem:[#allocation12 + $0x60] sm:$0xff] %v439_v61  ;;  %482 = vxpose.xlu0.b32.cont [10/16] (narrow) %v1134_v26, 8  ;;  %v449_v1 = vadd.f32 %v1125_v12, %v448_v0  ;;  %p939_p6 = scmp.ne.s32.totalorder %s524_s28, %s938_s5  ;;  %p944_p8 = scmp.lt.s32.totalorder %s938_s5, %s938_s5 }
 0x17f   :  { %472 = vst [vmem:[#allocation12 + $0x78] sm:$0xff] %v454_v63 }
 0x180   :  { %471 = vst [vmem:[#allocation12 + $0x70] sm:$0xff] %v449_v1  ;;  %p945_p9 = por %p944_p8, %p943_p7 }
 0x182   :  { %483 = vxpose.xlu0.b32.cont [11/16] (narrow) %v1148_v37, 8  ;;  %p946_p10 = pnand %p945_p9, %p939_p6 }
 0x184   :  { %949 = shalt.err (!%p946_p10)
}
 0x185   :  { %s950_s9 = scalar_lea.hbm %s1230_s6, 2048 }
 0x186   :  { %p951_p11 = scmp.ne.s32.totalorder %s1230_s6, %s950_s9  ;;  %p954_p12 = scmp.lt.u32.totalorder %s950_s9, %s1230_s6 }
 0x188   :  { %p956_p13 = pnand %p954_p12, %p951_p11 }
 0x18a   :  { %959 = shalt.err (!%p956_p13)
}
 0x18b   :  { %529 = dma.vmem_to_hbm [thread:$0]  %s524_s28, 2048, %s1230_s6, [#allocation13], %s994_s13, %s994_s13, %s995_s14   ;;  %484 = vxpose.xlu0.b32.cont [12/16] (narrow) %v1144_v34, 8 }
 0x18c   :  { %s1001_s2 = smov [#allocation14]  }
 0x18d   :  { %s536_s30 = sshll.u32 %s1001_s2, 4  ;;  %s537_s30 = int_to_ptr.vmem [resolvable:$true] %s536_s30 }
 0x18e   :  { %s960_s27 = scalar_lea.vmem %s537_s30, 128  ;;  %p965_p1 = scmp.lt.s32.totalorder %s537_s30, %s537_s30 }
 0x18f   :  { %485 = vxpose.xlu0.b32.cont [13/16] (narrow) %v1158_v45, 8  ;;  %p961_p0 = scmp.ne.s32.totalorder %s537_s30, %s960_s27  ;;  %p966_p2 = scmp.lt.s32.totalorder %s960_s27, %s960_s27 }
 0x191   :  { %p967_p3 = por %p966_p2, %p965_p1 }
 0x193   :  { %486 = vxpose.xlu0.b32.cont [14/16] (narrow) %v1154_v42, 8  ;;  %p968_p4 = pnand %p967_p3, %p961_p0 }
 0x197   :  { %487 = vxpose.xlu0.b32.cont [15/16] (narrow) %v265_v53, 8 }
 0x19b   :  { %488 = vxpose.xlu0.b32.end [16/16] (narrow) %v1164_v50, 8 }
 0x1df   :  { %v489_v2 = vpop.trf.xlu0 }
 0x1e0   :  { %505 = vst [vmem:[#allocation14] sm:$0xff] %v489_v2 }
 0x1e1   :  { %971 = shalt.err (!%p968_p4)
}
 0x1e2   :  { %s972_s14 = scalar_lea.hbm %s1231_s7, 128 }
 0x1e3   :  { %p973_p5 = scmp.ne.s32.totalorder %s1231_s7, %s972_s14  ;;  %p976_p6 = scmp.lt.u32.totalorder %s972_s14, %s1231_s7 }
 0x1e5   :  { %p978_p7 = pnand %p976_p6, %p973_p5 }
 0x1e7   :  { %981 = shalt.err (!%p978_p7)
}
 0x1e8   :  { %539 = dma.vmem_to_hbm [thread:$0]  %s537_s30, 128, %s1231_s7, [#allocation13]  }
 0x1e9   :  { %988 = dma.done.wait [#allocation4], 2048  }
 0x1ea   :  { %989 = vsyncadd [#allocation4], 4294965248 }
 0x1eb   :  { %990 = dma.done.wait [#allocation13], 2176  }
 0x1ec   :  { %991 = vsyncadd [#allocation13], 4294965120 }
 0x1ed   :  { %549 = vsyncpa [#allocation3], 1 }
 0x1ee   :  { %550 = vsyncpa [#allocation6], 1 }
 0x1ef   :  { %551 = vsyncpa [#allocation9], 1 }
 0x1f0   :  { %552 = vsyncpa [#allocation4], 1 }
 0x1f1   :  { %553 = vsyncpa [#allocation13], 1 }

</bundles_post_ra>
